<compile_context>
chip_gen: v7x
topology: tpu7x:2x2x1
jax: 0.10.0
libtpu: 0.0.40
codegen_flags: <defaults>
</compile_context>

<pallas_src>
import jax
import jax.numpy as jnp
from jax.experimental import pallas as pl
from jax.experimental.pallas import tpu as pltpu

input_dim = 2
hidden_dim = 10
output_dim = 1


def _mlp_kernel(w1_ref, b1_ref, w2_ref, b2_ref, x_ref, o_ref):
    """One batch tile: o = sigmoid(w2 @ relu(w1 @ x + b1) + b2).

    w1_ref: [hidden_dim, input_dim]    VMEM, grid-resident (same block every step)
    b1_ref: [hidden_dim, 1]            VMEM, grid-resident
    w2_ref: [output_dim, hidden_dim]   VMEM, grid-resident
    b2_ref: [output_dim]               SMEM scalar
    x_ref:  [input_dim, TB]            batch on the lane axis (streamed)
    o_ref:  [output_dim, TB]           lane-dense output tile
    """
    # Layer 1 contraction on the MXU (VALU slot was the binding unit before).
    h = jnp.dot(w1_ref[...], x_ref[...], preferred_element_type=jnp.float32)
    h = jnp.maximum(h + b1_ref[...], 0.0)          # bias + ReLU on the VPU
    # Layer 2 on the MXU as well: [1, hidden] @ [hidden, TB] -> [1, TB].
    z = jnp.dot(w2_ref[...], h, preferred_element_type=jnp.float32)
    z = z + b2_ref[0]                              # scalar bias straight from SMEM
    o_ref[...] = jax.nn.sigmoid(z).astype(o_ref.dtype)


def _mlp_pallas(x_t, w1, b1, w2, b2, *, tb):
    """Core pallas_call. x_t: [input_dim, b_pad] with b_pad % tb == 0, tb % 128 == 0."""
    in_dim, b_pad = x_t.shape
    assert in_dim == input_dim
    assert tb % 128 == 0 and b_pad % tb == 0
    n_tiles = b_pad // tb
    dtype = x_t.dtype

    # Advisory cost estimate so XLA can overlap the custom call with neighbours.
    flops = 2 * b_pad * hidden_dim * (input_dim + output_dim) + 3 * b_pad * hidden_dim
    bytes_accessed = ((input_dim + output_dim) * b_pad * jnp.dtype(dtype).itemsize
                      + 4 * (hidden_dim * (input_dim + 1)
                             + output_dim * (hidden_dim + 1)))

    return pl.pallas_call(
        _mlp_kernel,
        out_shape=jax.ShapeDtypeStruct((output_dim, b_pad), dtype),
        grid=(n_tiles,),
        in_specs=[
            # constant block index -> params stay VMEM-resident, one DMA total
            pl.BlockSpec((hidden_dim, input_dim), lambda i: (0, 0)),
            pl.BlockSpec((hidden_dim, 1), lambda i: (0, 0)),
            pl.BlockSpec((output_dim, hidden_dim), lambda i: (0, 0)),
            # single scalar bias -> SMEM, no padded (8,128) VMEM tile per step
            pl.BlockSpec(memory_space=pltpu.SMEM),
            # activation tile: streamed + double-buffered over the batch
            pl.BlockSpec((input_dim, tb), lambda i: (0, i)),
        ],
        out_specs=pl.BlockSpec((output_dim, tb), lambda i: (0, i)),
        compiler_params=pltpu.CompilerParams(
            # independent batch tiles -> shards across both TensorCores on v7x
            dimension_semantics=("parallel",),
            # headroom for large tiles on every generation (v5e default is 16 MiB)
            vmem_limit_bytes=32 * 1024 * 1024),
        cost_estimate=pl.CostEstimate(
            flops=int(flops),
            transcendentals=int(b_pad),
            bytes_accessed=int(bytes_accessed)),
    )(w1.astype(jnp.float32),
      b1.astype(jnp.float32).reshape(hidden_dim, 1),
      w2.astype(jnp.float32).reshape(output_dim, hidden_dim),
      b2.astype(jnp.float32).reshape(output_dim),
      x_t)


def neural_network_forward_t(x_t, w1, b1, w2, b2, *, tile_b=32768):
    """Features-first fast path (no wrapper-side transpose/pad/slice).

    x_t: [input_dim, Bp] with Bp a multiple of 128 (batch on lanes).
    Returns [output_dim, Bp] in the same layout.
    """
    b_p = x_t.shape[1]
    if b_p % 128 != 0:
        raise ValueError("features-first input needs a lane-padded batch (multiple of 128)")
    tb = max(128, min(int(tile_b) // 128 * 128, b_p))
    while b_p % tb:          # largest multiple of 128 (<= tile_b) dividing Bp
        tb -= 128
    return _mlp_pallas(x_t, w1, b1, w2, b2, tb=tb)


def neural_network_forward(x, w1, b1, w2, b2, *, tile_b=32768):
    """Fused MLP forward matching the PyTorch module.

    x:  [B, input_dim]            (feature-last, like nn.Linear input)
    w1: [hidden_dim, input_dim]   b1: [hidden_dim]
    w2: [output_dim, hidden_dim]  b2: [output_dim]
    returns [B, output_dim]

    tile_b: batch tile in lanes (multiple of 128). Default 32768 amortises the
    per-grid-step overhead; sweep 32K-256K for peak throughput (keep n_tiles>=2
    on v7x so both TensorCores are used). It is clamped for small batches.
    """
    B = x.shape[0]
    b128 = ((B + 127) // 128) * 128
    tb = max(128, min(int(tile_b) // 128 * 128, b128))
    n_tiles = pl.cdiv(b128, tb)
    b_pad = n_tiles * tb

    # Batch-on-lanes layout + zero-pad the ragged tail (single fused XLA op).
    # Producers that can emit [input_dim, B] directly should call
    # neural_network_forward_t to skip this extra HBM pass.
    x_t = jnp.zeros((input_dim, b_pad), x.dtype).at[:, :B].set(x.T)

    y_t = _mlp_pallas(x_t, w1, b1, w2, b2, tb=tb)

    # back to PyTorch layout [B, output_dim]
    return y_t[0, :B].reshape(B, output_dim)


def init_params(key):
    """Parameter init mirroring the PyTorch module (nn.Linear layouts)."""
    k1, k2, k3, k4 = jax.random.split(key, 4)

    # layer_1.weight: kaiming_uniform_ (relu gain), fan_in = input_dim
    bound1 = float(jnp.sqrt(2.0) * jnp.sqrt(3.0 / input_dim))
    w1 = jax.random.uniform(k1, (hidden_dim, input_dim), jnp.float32,
                            minval=-bound1, maxval=bound1)
    bb1 = 1.0 / float(jnp.sqrt(input_dim))
    b1 = jax.random.uniform(k2, (hidden_dim,), jnp.float32, minval=-bb1, maxval=bb1)

    # layer_2: PyTorch nn.Linear default bounds 1/sqrt(fan_in), fan_in = hidden_dim
    bound2 = 1.0 / float(jnp.sqrt(hidden_dim))
    w2 = jax.random.uniform(k3, (output_dim, hidden_dim), jnp.float32,
                            minval=-bound2, maxval=bound2)
    b2 = jax.random.uniform(k4, (output_dim,), jnp.float32,
                            minval=-bound2, maxval=bound2)
    return w1, b1, w2, b2


if __name__ == "__main__":
    key = jax.random.PRNGKey(0)
    k_x, k_p = jax.random.split(key)

    # deliberately not a multiple of 128: exercises pad + clamped tile
    batch = 300
    x = jax.random.normal(k_x, (batch, input_dim), dtype=jnp.float32)
    w1, b1, w2, b2 = init_params(k_p)

    # plain-JAX reference (PyTorch semantics)
    ref = jax.nn.sigmoid(jnp.maximum(x @ w1.T + b1, 0.0) @ w2.T + b2)

    # 1) default path (tile clamped to the padded batch -> single grid step)
    y = neural_network_forward(x, w1, b1, w2, b2)
    jax.block_until_ready(y)
    assert y.shape == (batch, output_dim)
    assert jnp.allclose(y, ref, atol=1e-5, rtol=1e-5), "mismatch vs reference (default tile)"

    # 2) small tile -> multi-step pipelined grid
    y2 = neural_network_forward(x, w1, b1, w2, b2, tile_b=128)
    jax.block_until_ready(y2)
    assert jnp.allclose(y2, ref, atol=1e-5, rtol=1e-5), "mismatch vs reference (tile_b=128)"

    # 3) features-first entry (no wrapper transpose/pad inside the call)
    b_pad = ((batch + 127) // 128) * 128
    x_t = jnp.zeros((input_dim, b_pad), x.dtype).at[:, :batch].set(x.T)
    y3 = neural_network_forward_t(x_t, w1, b1, w2, b2)
    jax.block_until_ready(y3)
    assert jnp.allclose(y3[0, :batch].reshape(batch, output_dim), ref,
                        atol=1e-5, rtol=1e-5), "mismatch vs reference (features-first)"

    print("KERNEL_OK")
</pallas_src>

<mosaic_0001>
module attributes {stable_mosaic.version = 11 : i64} {
  func.func @_mlp_kernel(%arg0: i32, %arg1: memref<10x2xf32, #tpu.memory_space<vmem>>, %arg2: memref<10x1xf32, #tpu.memory_space<vmem>>, %arg3: memref<1x10xf32, #tpu.memory_space<vmem>>, %arg4: memref<1xf32, #tpu.memory_space<smem>>, %arg5: memref<2x384xf32, #tpu.memory_space<vmem>>, %arg6: memref<1x384xf32, #tpu.memory_space<vmem>>) attributes {dimension_semantics = [#tpu.dimension_semantics<parallel>], iteration_bounds = array<i64: 1>, scalar_prefetch = 0 : i64, scratch_operands = 0 : i64, tpu.core_type = #tpu.core_type<tc>, window_params = [{pipeline_mode = #tpu.pipeline_mode<synchronous>, transform_indices = @transform_0, window_bounds = array<i64: 10, 2>}, {pipeline_mode = #tpu.pipeline_mode<synchronous>, transform_indices = @transform_1, window_bounds = array<i64: 10, 1>}, {pipeline_mode = #tpu.pipeline_mode<synchronous>, transform_indices = @transform_2, window_bounds = array<i64: 1, 10>}, {transform_indices = @transform_3, window_bounds = array<i64: 1>}, {transform_indices = @transform_4, window_bounds = array<i64: 2, 384>}, {transform_indices = @transform_5, window_bounds = array<i64: 1, 384>}]} {
    %c0 = arith.constant 0 : index
    %c0_0 = arith.constant 0 : index
    %0 = vector.load %arg1[%c0, %c0_0] : memref<10x2xf32, #tpu.memory_space<vmem>>, vector<10x2xf32>
    %c0_1 = arith.constant 0 : index
    %c0_2 = arith.constant 0 : index
    %1 = vector.load %arg5[%c0_1, %c0_2] : memref<2x384xf32, #tpu.memory_space<vmem>>, vector<2x384xf32>
    %cst = arith.constant dense<0.000000e+00> : vector<10x384xf32>
    %2 = tpu.matmul %0, %1, %cst {dimension_numbers = #tpu.dot_dimension_numbers<[1], [0], [0], [1], [0, 0, 1, 1], [], []>} : vector<10x2xf32>, vector<2x384xf32>, vector<10x384xf32> -> vector<10x384xf32>
    %c0_3 = arith.constant 0 : index
    %c0_4 = arith.constant 0 : index
    %3 = vector.load %arg2[%c0_3, %c0_4] : memref<10x1xf32, #tpu.memory_space<vmem>>, vector<10x1xf32>
    %4 = vector.broadcast %3 : vector<10x1xf32> to vector<10x384xf32>
    %5 = arith.addf %2, %4 : vector<10x384xf32>
    %cst_5 = arith.constant 0.000000e+00 : f32
    %6 = vector.broadcast %cst_5 : f32 to vector<10x384xf32>
    %7 = arith.maximumf %5, %6 : vector<10x384xf32>
    %c0_6 = arith.constant 0 : index
    %c0_7 = arith.constant 0 : index
    %8 = vector.load %arg3[%c0_6, %c0_7] : memref<1x10xf32, #tpu.memory_space<vmem>>, vector<1x10xf32>
    %cst_8 = arith.constant dense<0.000000e+00> : vector<1x384xf32>
    %9 = tpu.matmul %8, %7, %cst_8 {dimension_numbers = #tpu.dot_dimension_numbers<[1], [0], [0], [1], [0, 0, 1, 1], [], []>} : vector<1x10xf32>, vector<10x384xf32>, vector<1x384xf32> -> vector<1x384xf32>
    %c0_9 = arith.constant 0 : index
    %10 = memref.load %arg4[%c0_9] : memref<1xf32, #tpu.memory_space<smem>>
    %11 = vector.broadcast %10 : f32 to vector<1x384xf32>
    %12 = arith.addf %9, %11 : vector<1x384xf32>
    %13 = arith.negf %12 : vector<1x384xf32>
    %14 = math.exp %13 : vector<1x384xf32>
    %cst_10 = arith.constant 1.000000e+00 : f32
    %15 = vector.broadcast %cst_10 : f32 to vector<1x384xf32>
    %16 = arith.addf %15, %14 : vector<1x384xf32>
    %17 = arith.divf %15, %16 : vector<1x384xf32>
    %c0_11 = arith.constant 0 : index
    %c0_12 = arith.constant 0 : index
    %18 = vector.load %arg6[%c0_11, %c0_12] : memref<1x384xf32, #tpu.memory_space<vmem>>, vector<1x384xf32>
    tpu.vector_store %arg6[%c0_11, %c0_12], %17 {strides = array<i32>} : memref<1x384xf32, #tpu.memory_space<vmem>>, vector<1x384xf32>,
    return
  }
  func.func @transform_0(%arg0: i32) -> (i32, i32) {
    %c0_i32 = arith.constant 0 : i32
    %c0_i32_0 = arith.constant 0 : i32
    %c0_i32_1 = arith.constant 0 : i32
    return %c0_i32, %c0_i32_0 : i32, i32
  }
  func.func @transform_1(%arg0: i32) -> (i32, i32) {
    %c0_i32 = arith.constant 0 : i32
    %c0_i32_0 = arith.constant 0 : i32
    %c0_i32_1 = arith.constant 0 : i32
    return %c0_i32, %c0_i32_0 : i32, i32
  }
  func.func @transform_2(%arg0: i32) -> (i32, i32) {
    %c0_i32 = arith.constant 0 : i32
    %c0_i32_0 = arith.constant 0 : i32
    %c0_i32_1 = arith.constant 0 : i32
    return %c0_i32, %c0_i32_0 : i32, i32
  }
  func.func @transform_3(%arg0: i32) -> i32 {
    %c0_i32 = arith.constant 0 : i32
    %c0_i32_0 = arith.constant 0 : i32
    return %c0_i32 : i32
  }
  func.func @transform_4(%arg0: i32) -> (i32, i32) {
    %c0_i32 = arith.constant 0 : i32
    %c0_i32_0 = arith.constant 0 : i32
    return %c0_i32, %arg0 : i32, i32
  }
  func.func @transform_5(%arg0: i32) -> (i32, i32) {
    %c0_i32 = arith.constant 0 : i32
    %c0_i32_0 = arith.constant 0 : i32
    return %c0_i32, %arg0 : i32, i32
  }
}

</mosaic_0001>

<bundles_post_ra>
// kernel: tpu_custom_call.1
= control target key start
LH: loop header
LB: loop body
LE: loop exit
PB: predicated region body
PF: predicated region fallthrough
CT: control target
= control target key end

     0   :  { %v42_v1 = vlaneseq  ;;  %v536_v2 = vmov 1983009808   ;;  %v537_v4 = vmov 0.0   ;;  %vm54_vm0 = vcmask 15360   ;;  %s632_s0 = inlined_call_operand.vmem [shape: f32[10,2], index: 0, kind: input, shape index: {}]   ;;  %s633_s1 = inlined_call_operand.vmem [shape: f32[10,1], index: 1, kind: input, shape index: {}]   ;;  %s634_s2 = inlined_call_operand.vmem [shape: f32[1,10], index: 2, kind: input, shape index: {}]   ;;  %s635_s3 = inlined_call_operand.<no memory space> [shape: f32[1], index: 3, kind: input, shape index: {}]   ;;  %s636_s4 = inlined_call_operand.vmem [shape: f32[2,384], index: 4, kind: input, shape index: {}]   ;;  %s637_s5 = inlined_call_operand.hbm [shape: f32[1,384], index: 5, kind: output, shape index: {}]  }
   0x1   :  { %v24_v0 = vld [vmem:[%s636_s4] sm:$0x3f]  ;;  %v40_v3 = vunpack.c.l.s4 %v536_v2  ;;  %132 = vmatprep.mubr.f32.mxu0 %v537_v4  ;;  %v538_v8 = vmov 0  }
   0x2   :  { %v22_v5 = vld [vmem:[%s632_s0] sm:$0xff]  ;;  %v584_v7 = vshrl.u32 %v42_v1, 7  ;;  %498 = vset.pattern.permute.xlu0 %v538_v8 }
   0x3   :  { %v25_v6 = vld [vmem:[%s633_s1] sm:$0xff]  ;;  %470 = vmatprep.mubr.msk.f32.mxu1 %vm54_vm0, %v22_v5 }
   0x4   :  { %11 = vsyncpa [#allocation4], 0  ;;  %v41_v9 = vunpack.c.0.s8 %v40_v3  ;;  %v38_v10 = vcombine.high %v24_v0, %v24_v0  ;;  %29 = vperm.xlu0 %498, %v25_v6   ;;  %v26_v11 = vld [vmem:[%s633_s1 + $0x8] sm:$0x3]  ;;  %vm61_vm1 = vcmask 1041408   ;;  %v539_v17 = vmov 0.0|0.0  }
   0x5   :  { %v23_v15 = vld [vmem:[%s632_s0 + $0x8] sm:$0x3]  ;;  %vm540_vm2 = vmmov 0   ;;  %vm541_vm3 = vmmov 1   ;;  %v226_v40 = vld [vmem:[%s634_s2] sm:$0x1]  ;;  %v228_v43 = vstv %s635_s3 }
   0x6   :  { %v44_v12 = vsub.s32 %v41_v9, %v584_v7  ;;  %vm602_vm4 = vmpackc.low %vm61_vm1, %vm541_vm3  ;;  %vm229_vm5 = vcmask 80896   ;;  %v542_v60 = vmov 1966171168   ;;  %s543_s2 = smov [#allocation3]   ;;  %vm430_vm6 = vcmp.lt.s32.totalorder %v42_v1, 384 }
   0x7   :  { %v406_v61 = vunpack.c.l.s4 %v542_v60  ;;  %s439_s3 = sshll.u32 %s543_s2, 4  ;;  %s440_s3 = int_to_ptr.vmem [resolvable:$true] %s439_s3 }
   0x8   :  { %v45_v13 = vrot.slane %v24_v0, %v44_v12  ;;  %v52_v14 = vrot.slane %v38_v10, %v44_v12  ;;  %34 = vperm.xlu0 %498, %v26_v11   ;;  %s512_s29 = scalar_lea.vmem %s440_s3, 48  ;;  %s516_s30 = scalar_lea.vmem %s440_s3, 64 }
   0x9   :  { %v407_v62 = vunpack.c.0.s8 %v406_v61  ;;  %p513_p0 = scmp.ne.s32.totalorder %s440_s3, %s512_s29  ;;  %p517_p1 = scmp.lt.s32.totalorder %s440_s3, %s440_s3 }
   0xa   :  { %v53_v16 = vcombine.high %v45_v13, %v45_v13  ;;  %468 = vmatprep.subr.msk.mxu1 %vm61_vm1, %v52_v14  ;;  %p518_p2 = scmp.lt.s32.totalorder %s516_s30, %s512_s29 }
   0xb   :  { %469 = vmatpush3.msk.msra.mxu1 %vm61_vm1, %v52_v14  ;;  %v410_v63 = vsub.s32 %v407_v62, %v584_v7 }
   0xc   :  { %447 = vmatprep.subr.msk.mxu0 %vm61_vm1, %v53_v16  ;;  %471 = vmatmul.mubr.msk.f32.vlgmr.msra.gmra.mrb[0].mxu1 %vm54_vm0, %v23_v15  ;;  %p519_p3 = por %p518_p2, %p517_p1 }
   0xd   :  { %448 = vmatpush1.msk.msra.mxu0 %vm61_vm1, %v45_v13  ;;  %306 = vmatprep.mubr.f32.mxu1 %v537_v4 }
   0xe   :  { %449 = vmatmul.mubr.msk.f32.vlgmr.msra.gmra.mrb[0].mxu0 %vm54_vm0, %v22_v5  ;;  %486 = vmatprep.subr.bf16.mxu0 %v539_v17  ;;  %p520_p4 = pnand %p519_p3, %p513_p0 }
   0xf   :  { %138 = vmatprep.mubr.f32.mxu0 %v537_v4 }
  0x12   :  { %450 = vmatmul.mubr.msk.f32.gmra.mrb[2].mxu0 %vm54_vm0, %v23_v15 }
  0x13   :  { %477 = vmatprep.mubr.msk.f32.mxu0 %vm540_vm2, %v537_v4 }
  0x83   :  { %v30_v18 = vpop.permute.xlu0 %29 }
  0x87   :  { %v35_v19 = vpop.permute.xlu0 %34 }
  0xdf   :  { %v472_v20 = vpop.f32.mrb[0].mxu1 }
  0xe0   :  { %v217_v21 = vadd.f32 %v472_v20, %v35_v19  ;;  %v211_v22 = vpop.f32.mrb[1].mxu1 }
  0xe1   :  { %v134_v23 = vpop.f32.mrb[0].mxu0  ;;  %v212_v24 = vadd.f32 %v211_v22, %v30_v18 }
  0xe2   :  { %v225_v25 = vmax.f32 %v217_v21, 0.0  ;;  %v136_v26 = vpop.f32.mrb[1].mxu0  ;;  %v135_v28 = vadd.f32 %v134_v23, %v30_v18 }
  0xe3   :  { %v222_v27 = vmax.f32 %v212_v24, 0.0  ;;  %v137_v30 = vadd.f32 %v136_v26, %v30_v18 }
  0xe4   :  { %v220_v36 = vmax.f32 %v135_v28, 0.0 }
  0xe5   :  { %v487_v31 = vpack.c.bf16 %v225_v25, %v222_v27  ;;  %v140_v32 = vpop.f32.mrb[2].mxu0  ;;  %v221_v38 = vmax.f32 %v137_v30, 0.0 }
  0xe6   :  { %v141_v33 = vadd.f32 %v140_v32, %v35_v19  ;;  %v142_v34 = vpop.f32.mrb[3].mxu0 }
  0xe7   :  { %v143_v35 = vadd.f32 %v142_v34, %v35_v19  ;;  %489 = vmatpush3.bf16.msk.msra.mxu0 %vm602_vm4, %v487_v31 }
  0xe8   :  { %v223_v37 = vmax.f32 %v141_v33, 0.0 }
  0xe9   :  { %v224_v39 = vmax.f32 %v143_v35, 0.0 }
  0xea   :  { %v483_v41 = vpack.c.bf16 %v223_v37, %v220_v36  ;;  %478 = vmatmul.mubr.msk.f32.vlgmr.msra.gmra.mrb[4].mxu0 %vm229_vm5, %v226_v40 }
  0xeb   :  { %v480_v42 = vpack.c.bf16 %v224_v39, %v221_v38 }
  0xed   :  { %482 = vmatprep.subr.msk.bf16.mxu1 %vm602_vm4, %v480_v42 }
  0xee   :  { %485 = vmatpush1.bf16.msk.msra.mxu1 %vm602_vm4, %v483_v41 }
  0xf1   :  { %456 = vmatmul.mubr.msk.f32.vlgmr.msra.gmra.mrb[2].mxu1 %vm229_vm5, %v226_v40 }
 0x1bd   :  { %v379_v44 = vpop.f32.mrb[4].mxu0 }
 0x1be   :  { %v380_v45 = vadd.f32 %v379_v44, %v228_v43  ;;  %v479_v46 = vpop.f32.mrb[5].mxu0 }
 0x1c0   :  { %v461_v47 = vmul.f32 -1.442695, %v380_v45 }
 0x1c2   :  { %500 = vpow2.f32 %v461_v47 }
 0x1c4   :  { %v308_v48 = vpop.f32.mrb[2].mxu1 }
 0x1c5   :  { %v309_v49 = vadd.f32 %v308_v48, %v228_v43  ;;  %v310_v50 = vpop.f32.mrb[3].mxu1 }
 0x1c6   :  { %v311_v51 = vadd.f32 %v310_v50, %v228_v43 }
 0x1c7   :  { %v459_v52 = vmul.f32 -1.442695, %v309_v49 }
 0x1c8   :  { %v460_v53 = vmul.f32 -1.442695, %v311_v51 }
 0x1c9   :  { %502 = vpow2.f32 %v459_v52 }
 0x1ca   :  { %504 = vpow2.f32 %v460_v53 }
 0x1cc   :  { %v501_v54 = vpop.eup %500 }
 0x1cd   :  { %v394_v55 = vadd.f32 1.0, %v501_v54 }
 0x1cf   :  { %506 = vrcp.f32 %v394_v55 }
 0x1d3   :  { %v503_v56 = vpop.eup %502 }
 0x1d4   :  { %v505_v57 = vpop.eup %504  ;;  %v392_v58 = vadd.f32 1.0, %v503_v56 }
 0x1d5   :  { %v393_v59 = vadd.f32 1.0, %v505_v57 }
 0x1d6   :  { %508 = vrcp.f32 %v392_v58 }
 0x1d7   :  { %510 = vrcp.f32 %v393_v59 }
 0x1d9   :  { %v507_v0 = vpop.eup %506 }
 0x1da   :  { %v418_v5 = vrot.slane %v507_v0, %v410_v63 }
 0x1e0   :  { %v509_v2 = vpop.eup %508 }
 0x1e1   :  { %v511_v3 = vpop.eup %510 }
 0x1e2   :  { %v404_v4 = vcombine.low %v509_v2, %v511_v3 }
 0x1e4   :  { %v411_v6 = vrot.slane %v404_v4, %v410_v63 }
 0x1e6   :  { %v419_v8 = vcombine.low %v411_v6, %v418_v5 }
 0x1e8   :  { %v426_v9 = vrot.slane %v419_v8, %v410_v63 }
 0x1ea   :  { %432 = vst.msk [vmem:[#allocation3] sm:$0x7] %vm430_vm6, %v426_v9 }
 0x1eb   :  { %523 = shalt.err (!%p520_p4)
}
 0x1ec   :  { %s524_s8 = scalar_lea.hbm %s637_s5, 48 }
 0x1ed   :  { %p525_p5 = scmp.ne.s32.totalorder %s637_s5, %s524_s8  ;;  %p528_p6 = scmp.lt.u32.totalorder %s524_s8, %s637_s5 }
 0x1ef   :  { %p530_p7 = pnand %p528_p6, %p525_p5 }
 0x1f1   :  { %533 = shalt.err (!%p530_p7)
}
 0x1f2   :  { %442 = dma.vmem_to_hbm [thread:$0]  %s440_s3, 48, %s637_s5, [#allocation4]  }
 0x1f3   :  { %534 = dma.done.wait [#allocation4], 48  }
 0x1f4   :  { %535 = vsyncadd [#allocation4], 4294967248 }
 0x1f5   :  { %446 = vsyncpa [#allocation4], 1 }

</bundles_post_ra>
